<compile_context>
chip_gen: v7x
topology: tpu7x:2x2x1
jax: 0.10.0
libtpu: 0.0.40
codegen_flags: <defaults>
</compile_context>

<pallas_src>
import functools

import jax
import jax.numpy as jnp
import numpy as np
from jax.experimental import pallas as pl
from jax.experimental.pallas import tpu as pltpu

_LANES = 128
_MONO_PALLAS_MIN_PIXELS = 64 * 64   # below this, a fused XLA elementwise beats a launch


def _derive_vmem_budgets():
    """(block_budget_bytes, vmem_limit_bytes) tuned per TPU generation."""
    try:
        phys = int(pltpu.get_tpu_info().vmem_capacity_bytes)
    except Exception:
        phys = None
    if phys is not None and phys <= 64 * 1024 * 1024:      # v7x-class (64 MiB VMEM)
        return 20 * 1024 * 1024, 44 * 1024 * 1024
    if phys is not None:                                   # v5e / v6e (128 MiB VMEM)
        return 24 * 1024 * 1024, 64 * 1024 * 1024
    return 16 * 1024 * 1024, 40 * 1024 * 1024              # unknown: conservative


_VMEM_BLOCK_BUDGET, _VMEM_LIMIT_BYTES = _derive_vmem_budgets()


def _pick_row_tile(n_rows, bytes_per_row, budget_bytes=_VMEM_BLOCK_BUDGET):
    """Rows per block: a multiple of 8 (or the full extent), sized to the VMEM budget."""
    if n_rows <= 8:
        return int(n_rows)
    t = budget_bytes // max(int(bytes_per_row), 1)
    t = (t // 8) * 8
    if t < 8:
        t = 8
    if t >= n_rows:
        return int(n_rows)
    return int(t)


# --------------------------------------------------------------------- lane-dense layout
def _to_lane_dense(x, lanes=_LANES):
    """(..., H, W) -> ((..., ceil(H*W/lanes), lanes), n_rows).

    Flat pixel axis is edge-padded (replicate) to a multiple of `lanes`; free reshape
    when H*W is already a multiple of `lanes` (e.g. W = 1280 at production resolution).
    Edge padding keeps global min/max over the padded tensor identical to the original.
    """
    *lead, h, w = x.shape
    p = h * w
    prows = -(-p // lanes)
    pad = prows * lanes - p
    flat = x.reshape(*lead, p)
    if pad:
        flat = jnp.pad(flat, [(0, 0)] * len(lead) + [(0, pad)], mode="edge")
    return flat.reshape(*lead, prows, lanes), prows


def _from_lane_dense(y, h, w):
    """(..., prows, lanes) -> (..., H, W), dropping the flat-pixel padding."""
    *lead, prows, lanes = y.shape
    flat = y.reshape(*lead, prows * lanes)
    return flat[..., : h * w].reshape(*lead, h, w)


# ----------------------------------------------------------------------------- kernels
def _mono_head_kernel(scal_ref, x_ref, o_ref):
    # scal_ref (SMEM, (4,)): [bias, w_r, w_g, w_b]
    # x_ref: (3, tile_r, 128) lane-dense channel planes;  o_ref: (tile_r, 128).
    o_ref[...] = (scal_ref[0]
                  + scal_ref[1] * x_ref[0]
                  + scal_ref[2] * x_ref[1]
                  + scal_ref[3] * x_ref[2])


def _minmax_partial_kernel(x_ref, mn_ref, mx_ref, *, n_rows, tile_r):
    # Phase-1 of the two-phase global min/max: each grid step writes its own partial
    # min/max as an (8, 128) lane-dense slab (no serial SMEM accumulator -> the grid
    # can be "parallel" and split across TensorCores on v7x).
    i = pl.program_id(0)
    x = x_ref[...]
    last = pl.num_programs(0) - 1

    @pl.when(i < last)
    def _():
        mn_ref[...] = jnp.broadcast_to(jnp.min(x, axis=0, keepdims=True), (8, _LANES))
        mx_ref[...] = jnp.broadcast_to(jnp.max(x, axis=0, keepdims=True), (8, _LANES))

    @pl.when(i == last)
    def _():
        # Only the last block can overhang the array; mask those unspecified rows.
        row = jax.lax.broadcasted_iota(jnp.int32, x.shape, 0) + i * tile_r
        valid = row < n_rows
        mn_ref[...] = jnp.broadcast_to(
            jnp.min(jnp.where(valid, x, jnp.inf), axis=0, keepdims=True), (8, _LANES))
        mx_ref[...] = jnp.broadcast_to(
            jnp.max(jnp.where(valid, x, -jnp.inf), axis=0, keepdims=True), (8, _LANES))


def _stereo_head_kernel(scal_ref, l_ref, r_ref, ml_ref, mr_ref, o_ref):
    # scal_ref (SMEM, (11,)):
    #   [mono_min, inv=1/(mono_max-mono_min), bias, w_mono_l, w_mono_r,
    #    wl_r, wl_g, wl_b, wr_r, wr_g, wr_b]
    # l_ref/r_ref: (3, tile_r, 128); ml_ref/mr_ref: (tile_r, 128); o_ref: (tile_r, 128).
    mn = scal_ref[0]
    inv = scal_ref[1]                      # NOTE: inf/NaN if depths are constant,
    ml_n = (ml_ref[...] - mn) * inv        # matching the reference implementation.
    mr_n = (mr_ref[...] - mn) * inv
    disp = (scal_ref[2]
            + scal_ref[5] * l_ref[0] + scal_ref[6] * l_ref[1] + scal_ref[7] * l_ref[2]
            + scal_ref[8] * r_ref[0] + scal_ref[9] * r_ref[1] + scal_ref[10] * r_ref[2]
            + scal_ref[3] * ml_n + scal_ref[4] * mr_n)
    o_ref[...] = -disp                     # wrapper's `pred_disp = -pred_disps` fused here


# ----------------------------------------------------------------------------- pallas wrappers
def mono_head_pallas(small, mono_scal):
    """small: (N, 3, mh, mw) f32 -> (N, 1, mh, mw) synthetic mono depth (lane-dense)."""
    n, c, mh, mw = small.shape
    assert c == 3
    xd, prows = _to_lane_dense(small)                       # (N, 3, prows, 128)
    # Resident (double-buffered) bytes per row: (3 input + 1 output) planes * 2 buffers.
    tile_r = _pick_row_tile(prows, (c + 1) * _LANES * 4 * 2)
    grid = (n, pl.cdiv(prows, tile_r))
    out = pl.pallas_call(
        _mono_head_kernel,
        out_shape=jax.ShapeDtypeStruct((n, prows, _LANES), jnp.float32),
        grid=grid,
        in_specs=[
            pl.BlockSpec(memory_space=pltpu.MemorySpace.SMEM),
            pl.BlockSpec((None, c, tile_r, _LANES), lambda i, j: (i, 0, j, 0)),
        ],
        out_specs=pl.BlockSpec((None, tile_r, _LANES), lambda i, j: (i, j, 0)),
        compiler_params=pltpu.CompilerParams(
            dimension_semantics=("parallel", "parallel"),
            vmem_limit_bytes=_VMEM_LIMIT_BYTES),
    )(mono_scal, xd)
    return _from_lane_dense(out, mh, mw).reshape(n, 1, mh, mw)


def mono_depth_head(small, mono_scal):
    """Synthetic stand-in for the mono model's depth head on the resized input."""
    n, c, mh, mw = small.shape
    if mh * mw < _MONO_PALLAS_MIN_PIXELS:
        # Tiny mono resolution: plain jnp so XLA fuses the head into the resize.
        m = mono_scal
        return m[0] + m[1] * small[:, 0:1] + m[2] * small[:, 1:2] + m[3] * small[:, 2:3]
    return mono_head_pallas(small, mono_scal)


def minmax_pallas(x2d):
    """Two-phase global min/max over a lane-dense (rows, 128) f32 array -> scalars."""
    n_rows, lanes = x2d.shape
    assert lanes == _LANES
    tile_r = _pick_row_tile(n_rows, _LANES * 4 * 2)
    nblk = pl.cdiv(n_rows, tile_r)
    kernel = functools.partial(_minmax_partial_kernel, n_rows=n_rows, tile_r=tile_r)
    pmn, pmx = pl.pallas_call(
        kernel,
        out_shape=(jax.ShapeDtypeStruct((nblk, 8, _LANES), jnp.float32),
                   jax.ShapeDtypeStruct((nblk, 8, _LANES), jnp.float32)),
        grid=(nblk,),
        in_specs=[pl.BlockSpec((tile_r, _LANES), lambda i: (i, 0))],
        out_specs=(pl.BlockSpec((None, 8, _LANES), lambda i: (i, 0, 0)),
                   pl.BlockSpec((None, 8, _LANES), lambda i: (i, 0, 0))),
        compiler_params=pltpu.CompilerParams(
            dimension_semantics=("parallel",),
            vmem_limit_bytes=_VMEM_LIMIT_BYTES),
    )(x2d)
    # Phase 2: tiny (nblk*8*128 element) collapse; XLA handles it.
    return jnp.min(pmn), jnp.max(pmx)


def stereo_head_pallas(scal, left_ld, right_ld, ml_ld, mr_ld, prows):
    """Fused synthetic stereo head: normalize monos, 1x1 disparity head, negate.

    All inputs are lane-dense: left/right (B, 3, prows, 128), monos (MB, prows, 128).
    """
    b = left_ld.shape[0]
    mb = ml_ld.shape[0]
    # Resident planes per row: 3 (L) + 3 (R) + 1 (mL) + 1 (mR) + 1 (out), double-buffered.
    tile_r = _pick_row_tile(prows, 10 * _LANES * 4 * 2)
    grid = (b, pl.cdiv(prows, tile_r))
    img_spec = pl.BlockSpec((None, 3, tile_r, _LANES), lambda i, j: (i, 0, j, 0))
    if mb == b:
        mono_spec = pl.BlockSpec((None, tile_r, _LANES), lambda i, j: (i, j, 0))
    else:  # wrapper keeps mono_depths[0:1]/[1:2] (batch 1) -> broadcast across batch
        mono_spec = pl.BlockSpec((None, tile_r, _LANES), lambda i, j: (0, j, 0))
    return pl.pallas_call(
        _stereo_head_kernel,
        out_shape=jax.ShapeDtypeStruct((b, prows, _LANES), jnp.float32),
        grid=grid,
        in_specs=[
            pl.BlockSpec(memory_space=pltpu.MemorySpace.SMEM),
            img_spec, img_spec, mono_spec, mono_spec,
        ],
        out_specs=pl.BlockSpec((None, tile_r, _LANES), lambda i, j: (i, j, 0)),
        compiler_params=pltpu.CompilerParams(
            dimension_semantics=("parallel", "parallel"),
            vmem_limit_bytes=_VMEM_LIMIT_BYTES),
    )(scal, left_ld, right_ld, ml_ld, mr_ld)


# ----------------------------------------------------------------------------- glue
def stereo_anywhere_forward(params, args, left_image, right_image,
                            mono_left=None, mono_right=None, use_mono_model=True):
    left_image = left_image.astype(jnp.float32)
    right_image = right_image.astype(jnp.float32)
    b, _, h, w = left_image.shape

    # Lane-dense views of the full-resolution images (free reshape if H*W % 128 == 0).
    left_ld, prows = _to_lane_dense(left_image)              # (B, 3, prows, 128)
    right_ld, _ = _to_lane_dense(right_image)

    if use_mono_model:
        # Resize left & right separately and concatenate only the SMALL tensors
        # (no full-resolution HBM concat copy).
        mh, mw = args["mono_height"], args["mono_width"]
        small = jnp.concatenate(
            [jax.image.resize(left_image, (b, 3, mh, mw), method="bilinear"),
             jax.image.resize(right_image, (b, 3, mh, mw), method="bilinear")], axis=0)
        # TODO(synk): the real monocular ViT backbone is not translatable; replaced by a
        # deterministic 1x1-conv depth head run at (mono_height, mono_width) resolution.
        depth_small = mono_depth_head(small.astype(jnp.float32), params["mono"])  # (2B,1,mh,mw)
        mono_depths = jax.image.resize(depth_small, (2 * b, 1, h, w), method="bilinear")
        md_ld, _ = _to_lane_dense(mono_depths[:, 0])          # (2B, prows, 128), edge-padded
        # Joint min/max over both full-resolution depth maps (two-phase tiled reduction).
        # TODO(synk): fusing this min/max (and the bilinear upsample) into a Pallas
        # producing pass would save one full HBM read of mono_depths; kept separate here.
        mn, mx = minmax_pallas(md_ld.reshape(2 * b * prows, _LANES))
        inv = 1.0 / (mx - mn)          # normalization itself is fused into the stereo kernel
        # Faithful to `mono_depths[0].unsqueeze(0)` / `[1].unsqueeze(0)` of the wrapper.
        ml_ld = md_ld[0:1]
        mr_ld = md_ld[1:2]
    else:
        ml = (jnp.zeros_like(left_image[:, 0]) if mono_left is None
              else mono_left[:, 0].astype(jnp.float32))
        mr = (jnp.zeros_like(right_image[:, 0]) if mono_right is None
              else mono_right[:, 0].astype(jnp.float32))
        ml_ld, _ = _to_lane_dense(ml)
        mr_ld, _ = _to_lane_dense(mr)
        mn = jnp.float32(0.0)          # identity normalization in this branch
        inv = jnp.float32(1.0)

    # The original wrapper replicate-pads all four tensors to the next /32 size, runs
    # the stereo model, then crops back.  The synthetic stereo head is purely per-pixel,
    # so pad(replicate) -> head -> crop is pixel-for-pixel identical to running the head
    # on the unpadded tensors; the 4 full-tensor pad copies and the crop copy are elided.
    # TODO(synk): a real RAFT-style stereo model (args["iters"] iterative refinement)
    # does need the /32 replicate-padded inputs; reinstate pad/crop (or fold them into
    # the BlockSpec index_map) when swapping the real model back in.
    st = params["stereo"]
    scal = jnp.concatenate([jnp.stack([mn, inv]).reshape(2),
                            st["bias"], st["w_mono_l"], st["w_mono_r"],
                            st["w_left"], st["w_right"]]).astype(jnp.float32)

    pred_ld = stereo_head_pallas(scal, left_ld, right_ld, ml_ld, mr_ld, prows)
    # (B, H, W) == cropped (-pred_disps).squeeze(1)
    return _from_lane_dense(pred_ld, h, w)


def init_params():
    # Deterministic synthetic weights (shapes implied by the synthetic sub-modules).
    return {
        # [bias, w_r, w_g, w_b] of the mono 1x1 depth head
        "mono": jnp.array([0.05, 0.30, 0.55, 0.15], jnp.float32),
        "stereo": {
            "bias": jnp.array([0.02], jnp.float32),
            "w_mono_l": jnp.array([1.25], jnp.float32),
            "w_mono_r": jnp.array([-0.75], jnp.float32),
            "w_left": jnp.array([0.40, -0.20, 0.10], jnp.float32),
            "w_right": jnp.array([-0.30, 0.25, -0.05], jnp.float32),
        },
    }


# ----------------------------------------------------------------------------- pure-JAX reference
def _reference_forward(params, args, left, right):
    # Mirrors the PyTorch wrapper exactly (including the replicate pad + crop path).
    def mono(img):
        b, c, h, w = img.shape
        s = jax.image.resize(img, (b, c, args["mono_height"], args["mono_width"]),
                             method="bilinear")
        m = params["mono"]
        d = m[0] + m[1] * s[:, 0:1] + m[2] * s[:, 1:2] + m[3] * s[:, 2:3]
        return jax.image.resize(d, (b, 1, h, w), method="bilinear")

    dl, dr = mono(left), mono(right)
    md = jnp.concatenate([dl, dr], 0)
    md = (md - md.min()) / (md.max() - md.min())
    ml, mr = md[0:1], md[1:2]
    ht, wt = left.shape[-2:]
    pad_ht = ((ht // 32 + 1) * 32 - ht) % 32
    pad_wd = ((wt // 32 + 1) * 32 - wt) % 32
    _pad = [pad_wd // 2, pad_wd - pad_wd // 2, pad_ht // 2, pad_ht - pad_ht // 2]
    cfg = ((0, 0), (0, 0), (_pad[2], _pad[3]), (_pad[0], _pad[1]))
    lp = jnp.pad(left, cfg, mode="edge")
    rp = jnp.pad(right, cfg, mode="edge")
    mlp = jnp.pad(ml, cfg, mode="edge")
    mrp = jnp.pad(mr, cfg, mode="edge")
    st = params["stereo"]
    disp = (st["bias"][0]
            + st["w_left"][0] * lp[:, 0:1] + st["w_left"][1] * lp[:, 1:2] + st["w_left"][2] * lp[:, 2:3]
            + st["w_right"][0] * rp[:, 0:1] + st["w_right"][1] * rp[:, 1:2] + st["w_right"][2] * rp[:, 2:3]
            + st["w_mono_l"][0] * mlp + st["w_mono_r"][0] * mrp)
    pred = -disp[:, 0]
    hd, wd = pred.shape[-2:]
    c = [_pad[2], hd - _pad[3], _pad[0], wd - _pad[1]]
    return pred[:, c[0]:c[1], c[2]:c[3]]


# ----------------------------------------------------------------------------- main
if __name__ == "__main__":
    key = jax.random.PRNGKey(0)
    k1, k2 = jax.random.split(key)
    B, C, H, W = 1, 3, 30, 62          # non-multiple-of-32/128: exercises pad/crop elision
    left = jax.random.uniform(k1, (B, C, H, W), jnp.float32)
    right = jax.random.uniform(k2, (B, C, H, W), jnp.float32)
    params = init_params()

    # Config 1: tiny mono resolution -> fused-jnp mono head; Pallas min/max + stereo head.
    args_small = {"iters": 4, "mono_width": 28, "mono_height": 28}
    out1 = jax.block_until_ready(stereo_anywhere_forward(params, args_small, left, right))
    assert out1.shape == (B, H, W), out1.shape
    ref1 = jax.block_until_ready(_reference_forward(params, args_small, left, right))
    np.testing.assert_allclose(np.asarray(out1), np.asarray(ref1), rtol=1e-4, atol=1e-4)

    # Config 2: larger mono resolution -> Pallas mono head (lane-dense, no-pad branch).
    args_big = {"iters": 4, "mono_width": 128, "mono_height": 96}
    out2 = jax.block_until_ready(stereo_anywhere_forward(params, args_big, left, right))
    assert out2.shape == (B, H, W), out2.shape
    ref2 = jax.block_until_ready(_reference_forward(params, args_big, left, right))
    np.testing.assert_allclose(np.asarray(out2), np.asarray(ref2), rtol=1e-4, atol=1e-4)

    print("KERNEL_OK")
</pallas_src>

<mosaic_0001>
module attributes {stable_mosaic.version = 11 : i64} {
  func.func @_minmax_partial_kernel(%arg0: i32, %arg1: memref<30x128xf32, #tpu.memory_space<vmem>>, %arg2: memref<1x8x128xf32, #tpu.memory_space<vmem>>, %arg3: memref<1x8x128xf32, #tpu.memory_space<vmem>>) attributes {dimension_semantics = [#tpu.dimension_semantics<parallel>], iteration_bounds = array<i64: 1>, scalar_prefetch = 0 : i64, scratch_operands = 0 : i64, tpu.core_type = #tpu.core_type<tc>, window_params = [{transform_indices = @transform_0, window_bounds = array<i64: 30, 128>}, {transform_indices = @transform_1, window_bounds = array<i64: 1, 8, 128>}, {transform_indices = @transform_2, window_bounds = array<i64: 1, 8, 128>}]} {
    %c0 = arith.constant 0 : index
    %c0_0 = arith.constant 0 : index
    %0 = vector.load %arg1[%c0, %c0_0] : memref<30x128xf32, #tpu.memory_space<vmem>>, vector<30x128xf32>
    %c0_i32 = arith.constant 0 : i32
    %1 = arith.cmpi slt, %arg0, %c0_i32 : i32
    %2 = arith.extui %1 : i1 to i32
    %c0_i32_1 = arith.constant 0 : i32
    %3 = arith.cmpi ne, %2, %c0_i32_1 : i32
    scf.if %3 {
      %cst = arith.constant dense<0x7F800000> : vector<128xf32>
      %7 = vector.multi_reduction <minimumf>, %0, %cst [0] : vector<30x128xf32> to vector<128xf32>
      %8 = vector.shape_cast %7 : vector<128xf32> to vector<1x128xf32>
      %9 = vector.shape_cast %8 : vector<1x128xf32> to vector<1x128xf32>
      %10 = vector.broadcast %9 : vector<1x128xf32> to vector<8x128xf32>
      %c0_4 = arith.constant 0 : index
      %c0_5 = arith.constant 0 : index
      %c0_6 = arith.constant 0 : index
      %11 = vector.load %arg2[%c0_4, %c0_5, %c0_6] : memref<1x8x128xf32, #tpu.memory_space<vmem>>, vector<1x8x128xf32>
      %12 = vector.shape_cast %11 : vector<1x8x128xf32> to vector<8x128xf32>
      %13 = vector.shape_cast %10 : vector<8x128xf32> to vector<1x8x128xf32>
      tpu.vector_store %arg2[%c0_4, %c0_5, %c0_6], %13 {strides = array<i32>} : memref<1x8x128xf32, #tpu.memory_space<vmem>>, vector<1x8x128xf32>,
      %cst_7 = arith.constant dense<0xFF800000> : vector<128xf32>
      %14 = vector.multi_reduction <maximumf>, %0, %cst_7 [0] : vector<30x128xf32> to vector<128xf32>
      %15 = vector.shape_cast %14 : vector<128xf32> to vector<1x128xf32>
      %16 = vector.shape_cast %15 : vector<1x128xf32> to vector<1x128xf32>
      %17 = vector.broadcast %16 : vector<1x128xf32> to vector<8x128xf32>
      %c0_8 = arith.constant 0 : index
      %c0_9 = arith.constant 0 : index
      %c0_10 = arith.constant 0 : index
      %18 = vector.load %arg3[%c0_8, %c0_9, %c0_10] : memref<1x8x128xf32, #tpu.memory_space<vmem>>, vector<1x8x128xf32>
      %19 = vector.shape_cast %18 : vector<1x8x128xf32> to vector<8x128xf32>
      %20 = vector.shape_cast %17 : vector<8x128xf32> to vector<1x8x128xf32>
      tpu.vector_store %arg3[%c0_8, %c0_9, %c0_10], %20 {strides = array<i32>} : memref<1x8x128xf32, #tpu.memory_space<vmem>>, vector<1x8x128xf32>,
    } else {
    }
    %c0_i32_2 = arith.constant 0 : i32
    %4 = arith.cmpi eq, %arg0, %c0_i32_2 : i32
    %5 = arith.extui %4 : i1 to i32
    %c0_i32_3 = arith.constant 0 : i32
    %6 = arith.cmpi ne, %5, %c0_i32_3 : i32
    scf.if %6 {
      %7 = tpu.iota {dimensions = array<i32: 0>} : vector<30x128xi32>
      %c30_i32 = arith.constant 30 : i32
      %8 = arith.muli %arg0, %c30_i32 : i32
      %9 = vector.broadcast %8 : i32 to vector<30x128xi32>
      %10 = arith.addi %7, %9 : vector<30x128xi32>
      %c30_i32_4 = arith.constant 30 : i32
      %11 = vector.broadcast %c30_i32_4 : i32 to vector<30x128xi32>
      %12 = arith.cmpi slt, %10, %11 : vector<30x128xi32>
      %cst = arith.constant 0x7F800000 : f32
      %13 = vector.broadcast %cst : f32 to vector<30x128xf32>
      %14 = arith.select %12, %0, %13 : vector<30x128xi1>, vector<30x128xf32>
      %cst_5 = arith.constant dense<0x7F800000> : vector<128xf32>
      %15 = vector.multi_reduction <minimumf>, %14, %cst_5 [0] : vector<30x128xf32> to vector<128xf32>
      %16 = vector.shape_cast %15 : vector<128xf32> to vector<1x128xf32>
      %17 = vector.shape_cast %16 : vector<1x128xf32> to vector<1x128xf32>
      %18 = vector.broadcast %17 : vector<1x128xf32> to vector<8x128xf32>
      %c0_6 = arith.constant 0 : index
      %c0_7 = arith.constant 0 : index
      %c0_8 = arith.constant 0 : index
      %19 = vector.load %arg2[%c0_6, %c0_7, %c0_8] : memref<1x8x128xf32, #tpu.memory_space<vmem>>, vector<1x8x128xf32>
      %20 = vector.shape_cast %19 : vector<1x8x128xf32> to vector<8x128xf32>
      %21 = vector.shape_cast %18 : vector<8x128xf32> to vector<1x8x128xf32>
      tpu.vector_store %arg2[%c0_6, %c0_7, %c0_8], %21 {strides = array<i32>} : memref<1x8x128xf32, #tpu.memory_space<vmem>>, vector<1x8x128xf32>,
      %cst_9 = arith.constant 0xFF800000 : f32
      %22 = vector.broadcast %cst_9 : f32 to vector<30x128xf32>
      %23 = arith.select %12, %0, %22 : vector<30x128xi1>, vector<30x128xf32>
      %cst_10 = arith.constant dense<0xFF800000> : vector<128xf32>
      %24 = vector.multi_reduction <maximumf>, %23, %cst_10 [0] : vector<30x128xf32> to vector<128xf32>
      %25 = vector.shape_cast %24 : vector<128xf32> to vector<1x128xf32>
      %26 = vector.shape_cast %25 : vector<1x128xf32> to vector<1x128xf32>
      %27 = vector.broadcast %26 : vector<1x128xf32> to vector<8x128xf32>
      %c0_11 = arith.constant 0 : index
      %c0_12 = arith.constant 0 : index
      %c0_13 = arith.constant 0 : index
      %28 = vector.load %arg3[%c0_11, %c0_12, %c0_13] : memref<1x8x128xf32, #tpu.memory_space<vmem>>, vector<1x8x128xf32>
      %29 = vector.shape_cast %28 : vector<1x8x128xf32> to vector<8x128xf32>
      %30 = vector.shape_cast %27 : vector<8x128xf32> to vector<1x8x128xf32>
      tpu.vector_store %arg3[%c0_11, %c0_12, %c0_13], %30 {strides = array<i32>} : memref<1x8x128xf32, #tpu.memory_space<vmem>>, vector<1x8x128xf32>,
    } else {
    }
    return
  }
  func.func @transform_0(%arg0: i32) -> (i32, i32) {
    %c0_i32 = arith.constant 0 : i32
    %c0_i32_0 = arith.constant 0 : i32
    return %arg0, %c0_i32 : i32, i32
  }
  func.func @transform_1(%arg0: i32) -> (i32, i32, i32) {
    %c0_i32 = arith.constant 0 : i32
    %c0_i32_0 = arith.constant 0 : i32
    %c0_i32_1 = arith.constant 0 : i32
    return %arg0, %c0_i32, %c0_i32_0 : i32, i32, i32
  }
  func.func @transform_2(%arg0: i32) -> (i32, i32, i32) {
    %c0_i32 = arith.constant 0 : i32
    %c0_i32_0 = arith.constant 0 : i32
    %c0_i32_1 = arith.constant 0 : i32
    return %arg0, %c0_i32, %c0_i32_0 : i32, i32, i32
  }
}

</mosaic_0001>

<bundles_post_ra>
// kernel: tpu_custom_call.1
= control target key start
LH: loop header
LB: loop body
LE: loop exit
PB: predicated region body
PF: predicated region fallthrough
CT: control target
= control target key end

     0   :  { %8 = vsyncpa [#allocation3], 0  ;;  %s269_s0 = inlined_call_operand.hbm [shape: f32[30,128], index: 0, kind: input, shape index: {}]   ;;  %s270_s1 = inlined_call_operand.hbm [shape: f32[1,8,128], index: 1, kind: output, shape index: {0}]   ;;  %s271_s2 = inlined_call_operand.hbm [shape: f32[1,8,128], index: 2, kind: output, shape index: {1}]  }
   0x1   :  { %9 = vsyncpa [#allocation4], 0 }
   0x2   :  { %10 = vsyncpa [#allocation7], 0  ;;  %s213_s9 = smov [#allocation2]   ;;  %s141_s13 = scalar_lea.hbm %s269_s0, 512 }
   0x3   :  { %s16_s10 = sshll.u32 %s213_s9, 4  ;;  %p142_p0 = scmp.ne.s32.totalorder %s269_s0, %s141_s13  ;;  %s17_s10 = int_to_ptr.vmem [resolvable:$true] %s16_s10 }
   0x4   :  { %p145_p1 = scmp.lt.u32.totalorder %s141_s13, %s269_s0 }
   0x6   :  { %p147_p2 = pnand %p145_p1, %p142_p0 }
   0x8   :  { %150 = shalt.err (!%p147_p2)
}
   0x9   :  { %s151_s18 = scalar_lea.vmem %s17_s10, 512  ;;  %p156_p4 = scmp.lt.s32.totalorder %s17_s10, %s17_s10 }
   0xa   :  { %p152_p3 = scmp.ne.s32.totalorder %s17_s10, %s151_s18  ;;  %p157_p5 = scmp.lt.s32.totalorder %s151_s18, %s151_s18 }
   0xc   :  { %p158_p6 = por %p157_p5, %p156_p4 }
   0xe   :  { %p159_p7 = pnand %p158_p6, %p152_p3 }
  0x10   :  { %162 = shalt.err (!%p159_p7)
}
  0x11   :  { %s214_s19 = smov 128   ;;  %s215_s20 = smov 8  }
  0x12   :  { %22 = dma.hbm_to_vmem [thread:$0]  %s269_s0, 512, %s17_s10, [#allocation3], %s214_s19, %s214_s19, %s215_s20  }
  0x13   :  { %207 = dma.done.wait [#allocation3], 512  }
  0x14   :  { %208 = vsyncadd [#allocation3], 4294966784  ;;  %v61_v0 = vlaneseq  ;;  %v26_v3 = vld [vmem:[#allocation2] sm:$0xff]  ;;  %v27_v4 = vld [vmem:[#allocation2 + $0x8] sm:$0xff]  ;;  %vm80_vm1 = vcmask 1045504   ;;  %s216_s0 = smov [#allocation5]  }
  0x15   :  { %v28_v5 = vld [vmem:[#allocation2 + $0x10] sm:$0xff]  ;;  %v29_v6 = vld [vmem:[#allocation2 + $0x18] sm:$0x3f]  ;;  %v82_v8 = vmin.f32 %v26_v3, %v27_v4  ;;  %v97_v10 = vmax.f32 %v26_v3, %v27_v4  ;;  %s113_s23 = sshll.u32 %s216_s0, 4  ;;  %s217_s24 = smov [#allocation6]   ;;  %s114_s23 = int_to_ptr.vmem [resolvable:$true] %s113_s23 }
  0x16   :  { %v62_v1 = vshrl.u32 %v61_v0, 7  ;;  %s123_s25 = sshll.u32 %s217_s24, 4  ;;  %s163_s26 = scalar_lea.vmem %s114_s23, 128  ;;  %s124_s25 = int_to_ptr.vmem [resolvable:$true] %s123_s25 }
  0x17   :  { %p164_p8 = scmp.ne.s32.totalorder %s114_s23, %s163_s26  ;;  %p168_p9 = scmp.lt.s32.totalorder %s114_s23, %s114_s23 }
  0x18   :  { %v65_v2 = vadd.s32 24, %v62_v1  ;;  %p169_p10 = scmp.lt.s32.totalorder %s163_s26, %s163_s26 }
  0x1a   :  { %vm75_vm0 = vcmp.lt.s32.totalorder %v65_v2, 30  ;;  %p170_p11 = por %p169_p10, %p168_p9 }
  0x1b   :  { %v79_v7 = vsel %vm75_vm0, %v29_v6, inf  ;;  %v95_v9 = vsel %vm75_vm0, %v29_v6, -inf }
  0x1c   :  { %v81_v11 = vsel %vm80_vm1, %v79_v7, inf  ;;  %v96_v12 = vsel %vm80_vm1, %v95_v9, -inf  ;;  %p171_p12 = pnand %p170_p11, %p164_p8 }
  0x1d   :  { %v83_v13 = vmin.f32 %v28_v5, %v81_v11  ;;  %v98_v14 = vmax.f32 %v28_v5, %v96_v12 }
  0x1f   :  { %v84_v15 = vmin.f32 %v82_v8, %v83_v13  ;;  %v99_v16 = vmax.f32 %v97_v10, %v98_v14 }
  0x21   :  { %v85_v17 = vrot.slane %v84_v15, 4  ;;  %v100_v18 = vrot.slane %v99_v16, 4 }
  0x23   :  { %v86_v19 = vmin.f32 %v84_v15, %v85_v17  ;;  %v101_v20 = vmax.f32 %v99_v16, %v100_v18 }
  0x25   :  { %v87_v21 = vrot.slane %v86_v19, 2  ;;  %v102_v22 = vrot.slane %v101_v20, 2 }
  0x27   :  { %v88_v23 = vmin.f32 %v86_v19, %v87_v21  ;;  %v103_v24 = vmax.f32 %v101_v20, %v102_v22 }
  0x29   :  { %v89_v25 = vrot.slane %v88_v23, 1  ;;  %v104_v26 = vrot.slane %v103_v24, 1 }
  0x2b   :  { %v90_v27 = vmin.f32 %v88_v23, %v89_v25  ;;  %v105_v28 = vmax.f32 %v103_v24, %v104_v26 }
  0x2d   :  { %91 = vst [vmem:[#allocation5] sm:$0xff] %v90_v27  ;;  %106 = vst [vmem:[#allocation6] sm:$0xff] %v105_v28 }
  0x2e   :  { %174 = shalt.err (!%p171_p12)
}
  0x2f   :  { %s175_s29 = scalar_lea.hbm %s270_s1, 128 }
  0x30   :  { %p176_p13 = scmp.ne.s32.totalorder %s270_s1, %s175_s29  ;;  %p179_p0 = scmp.lt.u32.totalorder %s175_s29, %s270_s1 }
  0x32   :  { %p181_p1 = pnand %p179_p0, %p176_p13 }
  0x34   :  { %184 = shalt.err (!%p181_p1)
}
  0x35   :  { %116 = dma.vmem_to_hbm [thread:$0]  %s114_s23, 128, %s270_s1, [#allocation4]  }
  0x36   :  { %s185_s8 = scalar_lea.vmem %s124_s25, 128  ;;  %p190_p3 = scmp.lt.s32.totalorder %s124_s25, %s124_s25 }
  0x37   :  { %p186_p2 = scmp.ne.s32.totalorder %s124_s25, %s185_s8  ;;  %p191_p4 = scmp.lt.s32.totalorder %s185_s8, %s185_s8 }
  0x39   :  { %p192_p5 = por %p191_p4, %p190_p3 }
  0x3b   :  { %p193_p6 = pnand %p192_p5, %p186_p2 }
  0x3d   :  { %196 = shalt.err (!%p193_p6)
}
  0x3e   :  { %s197_s11 = scalar_lea.hbm %s271_s2, 128 }
  0x3f   :  { %p198_p7 = scmp.ne.s32.totalorder %s271_s2, %s197_s11  ;;  %p201_p8 = scmp.lt.u32.totalorder %s197_s11, %s271_s2 }
  0x41   :  { %p203_p9 = pnand %p201_p8, %p198_p7 }
  0x43   :  { %206 = shalt.err (!%p203_p9)
}
  0x44   :  { %126 = dma.vmem_to_hbm [thread:$0]  %s124_s25, 128, %s271_s2, [#allocation7]  }
  0x45   :  { %209 = dma.done.wait [#allocation4], 128  }
  0x46   :  { %210 = vsyncadd [#allocation4], 4294967168 }
  0x47   :  { %211 = dma.done.wait [#allocation7], 128  }
  0x48   :  { %212 = vsyncadd [#allocation7], 4294967168 }
  0x49   :  { %133 = vsyncpa [#allocation3], 1 }
  0x4a   :  { %134 = vsyncpa [#allocation4], 1 }
  0x4b   :  { %135 = vsyncpa [#allocation7], 1 }

</bundles_post_ra>
